<compile_context>
chip_gen: v7x
topology: tpu7x:2x2x1
jax: 0.10.0
libtpu: 0.0.40
codegen_flags: <defaults>
</compile_context>

<pallas_src>
import functools
import math

import jax
import jax.numpy as jnp
from jax import lax
from jax.experimental import pallas as pl
from jax.experimental.pallas import tpu as pltpu

_LANE = 128
_SUB = 8
_SLAB = _SUB * _LANE          # 1024 elements per (8,128) vreg slab
_NEG = -1e30                  # finite "minus infinity" for f32 accumulators


def _cdiv(a, b):
    return (a + b - 1) // b


def _kl_stats_kernel(e_ref, p_ref, out_ref, *, rows_valid, needs_mask):
    """Accumulate per-lane-position softmax/KL statistics for one (B, TILE_R, 128) tile.

    out_ref block: (1, 5*B, 8, 128) f32, resident across the k axis, laid out as
      [m_e | z_e | w_e | m_p | z_p] slabs of shape (B, 8, 128) each.
    """
    c = pl.program_id(0)
    k = pl.program_id(1)
    b, tile_r, _ = e_ref.shape
    s_blocks = tile_r // _SUB
    g = c * pl.num_programs(1) + k            # global row-block index (unclamped)

    @pl.when(k == 0)
    def _init():
        neg = jnp.full((b, _SUB, _LANE), _NEG, jnp.float32)
        zero = jnp.zeros((b, _SUB, _LANE), jnp.float32)
        out_ref[0, 0 * b:1 * b] = neg         # m_e
        out_ref[0, 1 * b:2 * b] = zero        # z_e
        out_ref[0, 2 * b:3 * b] = zero        # w_e
        out_ref[0, 3 * b:4 * b] = neg         # m_p
        out_ref[0, 4 * b:5 * b] = zero        # z_p

    def accumulate(use_mask):
        m_e = out_ref[0, 0 * b:1 * b]
        z_e = out_ref[0, 1 * b:2 * b]
        w_e = out_ref[0, 2 * b:3 * b]
        m_p = out_ref[0, 3 * b:4 * b]
        z_p = out_ref[0, 4 * b:5 * b]

        if use_mask:
            # Global row of a sub-block element is g*tile_r + off + sublane.
            sub_iota = lax.broadcasted_iota(jnp.int32, (_SUB, _LANE), 0)
            row0 = g * tile_r

            def row_mask(off):
                return ((row0 + off + sub_iota) < rows_valid)[None]   # (1, 8, 128)

        def load(ref, off):
            return ref[:, pl.ds(off, _SUB), :].astype(jnp.float32)

        unroll = min(s_blocks, 8)

        # ---- pass 1: per-lane-position running max (pure VPU, no XLU) -------------
        def p1(s, carry):
            tme, tmp_ = carry
            off = pl.multiple_of(s * _SUB, _SUB)
            e = load(e_ref, off)
            p = load(p_ref, off)
            if use_mask:
                m = row_mask(off)
                e = jnp.where(m, e, _NEG)
                p = jnp.where(m, p, _NEG)
            return jnp.maximum(tme, e), jnp.maximum(tmp_, p)

        m_e_new, m_p_new = lax.fori_loop(0, s_blocks, p1, (m_e, m_p), unroll=unroll)

        # One rescale exp per accumulator vreg per tile (not per element).
        a_e = jnp.exp(m_e - m_e_new)
        a_p = jnp.exp(m_p - m_p_new)
        z_e = a_e * z_e
        w_e = a_e * w_e
        z_p = a_p * z_p

        # ---- pass 2: exp + accumulate (exactly 2 exp per element-pair) ------------
        def p2(s, carry):
            ze, we, zp = carry
            off = pl.multiple_of(s * _SUB, _SUB)
            e = load(e_ref, off)
            p = load(p_ref, off)
            ee = jnp.exp(e - m_e_new)
            pe = jnp.exp(p - m_p_new)
            wt = ee * (e - p)
            if use_mask:
                m = row_mask(off)
                ee = jnp.where(m, ee, 0.0)
                wt = jnp.where(m, wt, 0.0)
                pe = jnp.where(m, pe, 0.0)
            return ze + ee, we + wt, zp + pe

        z_e, w_e, z_p = lax.fori_loop(0, s_blocks, p2, (z_e, w_e, z_p), unroll=unroll)

        # Lane-dense, full-width stores of whole (8,128) slabs.
        out_ref[0, 0 * b:1 * b] = m_e_new
        out_ref[0, 1 * b:2 * b] = z_e
        out_ref[0, 2 * b:3 * b] = w_e
        out_ref[0, 3 * b:4 * b] = m_p_new
        out_ref[0, 4 * b:5 * b] = z_p

    if needs_mask:
        is_partial = (g + 1) * tile_r > rows_valid
        pl.when(jnp.logical_not(is_partial))(lambda: accumulate(False))
        pl.when(is_partial)(lambda: accumulate(True))
    else:
        accumulate(False)


def _default_num_chunks():
    # Two TensorCores per chip only on v7x-class parts; elsewhere the "parallel"
    # grid axis is a serial loop, so a single chunk avoids round-up/epilogue work.
    try:
        kind = jax.devices()[0].device_kind.lower()
    except Exception:
        return 1
    return 2 if ("v7" in kind or "7x" in kind) else 1


def _tail_stats(e_t, p_t):
    """Per-batch (m_e, Z_e, W_e, m_p, Z_p) for a small (B, rem) remainder, in plain JAX."""
    e_t = e_t.astype(jnp.float32)
    p_t = p_t.astype(jnp.float32)
    m_e = jnp.max(e_t, axis=1)
    ee = jnp.exp(e_t - m_e[:, None])
    z_e = jnp.sum(ee, axis=1)
    w_e = jnp.sum(ee * (e_t - p_t), axis=1)
    m_p = jnp.max(p_t, axis=1)
    z_p = jnp.sum(jnp.exp(p_t - m_p[:, None]), axis=1)
    return (m_e[:, None], z_e[:, None], w_e[:, None], m_p[:, None], z_p[:, None])


def loss_sequence(expected, predicted, *, num_chunks=None, tile_rows=None):
    """KLDivLoss(batchmean) between softmax(expected) and softmax(predicted),
    softmax taken over all non-batch dims (matches the PyTorch LossSequence)."""
    assert expected.shape == predicted.shape
    b = expected.shape[0]
    n = int(math.prod(expected.shape[1:]))
    if n == 0:
        return jnp.float32(0.0)

    e2 = expected.reshape(b, n)
    p2 = predicted.reshape(b, n)

    n_main = (n // _SLAB) * _SLAB             # multiple of 1024 -> lane rows multiple of 8
    rem = n - n_main

    parts = []                                # list of (m_e, z_e, w_e, m_p, z_p), each (B, K_i)

    if n_main > 0:
        r0 = n_main // _LANE                  # lane-dense rows of real data (multiple of 8)
        # Metadata-only reshape when rem == 0; the slice materializes only in the
        # (rare) non-multiple-of-1024 case, and only the main slab (no pad values).
        e_main = e2 if rem == 0 else e2[:, :n_main]
        p_main = p2 if rem == 0 else p2[:, :n_main]
        e3 = e_main.reshape(b, r0, _LANE)
        p3 = p_main.reshape(b, r0, _LANE)

        # ---- tile sizing: ~2 MiB per pipelined input block (2 inputs x 2 buffers
        # ~= 8 MiB) fits every generation's scoped-VMEM default with headroom.
        itemsize = jnp.dtype(e3.dtype).itemsize
        target_block_bytes = 2 * 1024 * 1024
        cap = target_block_bytes // (b * _LANE * itemsize)
        cap = max(_SUB, min(8192, (cap // _SUB) * _SUB))
        if tile_rows is not None:
            cap = max(_SUB, (int(tile_rows) // _SUB) * _SUB)
        tile_r = min(cap, r0)

        rb = _cdiv(r0, tile_r)                # row-blocks that contain real data
        nc = _default_num_chunks() if num_chunks is None else int(num_chunks)
        nc = max(1, min(nc, rb))
        k_steps = _cdiv(rb, nc)               # balanced: chunks differ by at most 1 block
        needs_mask = (nc * k_steps * tile_r) > r0

        block_bytes = b * tile_r * _LANE * itemsize
        vmem_need = 4 * block_bytes + 4 * (5 * b * _SLAB * 4)
        cp_kwargs = dict(dimension_semantics=("parallel", "arbitrary"))
        if vmem_need > 12 * 1024 * 1024:
            cp_kwargs["vmem_limit_bytes"] = int(min(64 * 1024 * 1024, 2 * vmem_need))

        kernel = functools.partial(_kl_stats_kernel, rows_valid=r0, needs_mask=needs_mask)
        # Clamp the row-block so no DMA is ever issued out of bounds; the kernel
        # masks any duplicated/partial block based on its *unclamped* index.
        in_map = lambda c, k: (0, jnp.minimum(c * k_steps + k, rb - 1), 0)

        stats = pl.pallas_call(
            kernel,
            out_shape=jax.ShapeDtypeStruct((nc, 5 * b, _SUB, _LANE), jnp.float32),
            grid=(nc, k_steps),
            in_specs=[
                pl.BlockSpec((b, tile_r, _LANE), in_map),
                pl.BlockSpec((b, tile_r, _LANE), in_map),
            ],
            out_specs=pl.BlockSpec((1, 5 * b, _SUB, _LANE), lambda c, k: (c, 0, 0, 0)),
            compiler_params=pltpu.CompilerParams(**cp_kwargs),
        )(e3, p3)

        # (nc, 5*B, 8, 128) -> per-quantity (B, nc*1024) partial streams.
        st = stats.reshape(nc, 5, b, _SLAB)
        st = jnp.transpose(st, (2, 1, 0, 3)).reshape(b, 5, nc * _SLAB)
        parts.append((st[:, 0], st[:, 1], st[:, 2], st[:, 3], st[:, 4]))

    if rem > 0:
        # TODO(synk): the <=1023-element remainder is reduced in plain JAX; negligible
        # work, and it avoids any full-array padding copy in front of the kernel.
        parts.append(_tail_stats(e2[:, n_main:], p2[:, n_main:]))

    m_e = jnp.concatenate([q[0] for q in parts], axis=1)
    z_e = jnp.concatenate([q[1] for q in parts], axis=1)
    w_e = jnp.concatenate([q[2] for q in parts], axis=1)
    m_p = jnp.concatenate([q[3] for q in parts], axis=1)
    z_p = jnp.concatenate([q[4] for q in parts], axis=1)

    # ---- tiny O(nc*B*1024) epilogue: merge partial streams, finish KL, batchmean.
    me = jnp.max(m_e, axis=1)
    se = jnp.exp(m_e - me[:, None])
    ze = jnp.sum(z_e * se, axis=1)
    we = jnp.sum(w_e * se, axis=1)

    mp = jnp.max(m_p, axis=1)
    sp = jnp.exp(m_p - mp[:, None])
    zp = jnp.sum(z_p * sp, axis=1)

    lse_e = me + jnp.log(ze)
    lse_p = mp + jnp.log(zp)
    kl = we / ze + (lse_p - lse_e)            # per-batch KL
    return jnp.sum(kl) / jnp.float32(b)       # batchmean over the TRUE batch size


def _loss_sequence_ref(expected, predicted):
    """Pure-JAX reference mirroring the PyTorch module."""
    b = expected.shape[0]
    e = expected.reshape(b, -1).astype(jnp.float32)
    p = predicted.reshape(b, -1).astype(jnp.float32)
    pe = jax.nn.softmax(e, axis=1)
    pp = jax.nn.softmax(p, axis=1)
    return jnp.sum(pe * (jnp.log(pe) - jnp.log(pp))) / b


if __name__ == "__main__":
    key = jax.random.PRNGKey(0)
    ks = jax.random.split(key, 8)

    def check(e, p, **kw):
        out = jax.block_until_ready(loss_sequence(e, p, **kw))
        ref = _loss_sequence_ref(e, p)
        assert jnp.allclose(out, ref, rtol=1e-4, atol=1e-5), (out, ref, kw)

    # Primary 5-D shape (B, C, D, H, W): N = 4*8*16*16 = 8192 (multiple of 1024).
    shape = (2, 4, 8, 16, 16)
    e = jax.random.normal(ks[0], shape, dtype=jnp.float32)
    p = jax.random.normal(ks[1], shape, dtype=jnp.float32)
    check(e, p)                                         # single-tile fast path
    check(e, p, num_chunks=2, tile_rows=8)              # multi-step accumulation + chunk merge

    # N = 4*8*16*20 = 10240: tile sizes that force the masked partial-block path.
    shape_m = (2, 4, 8, 16, 20)
    em = jax.random.normal(ks[2], shape_m, dtype=jnp.float32)
    pm = jax.random.normal(ks[3], shape_m, dtype=jnp.float32)
    check(em, pm, num_chunks=2, tile_rows=24)           # partial last block (masked)
    check(em, pm, num_chunks=2, tile_rows=32)           # + fully out-of-range duplicate block

    # N = 4*8*16*17 = 8704: kernel main part + <=1023-element JAX-epilogue tail.
    shape_t = (2, 4, 8, 16, 17)
    et = jax.random.normal(ks[4], shape_t, dtype=jnp.float32)
    pt = jax.random.normal(ks[5], shape_t, dtype=jnp.float32)
    check(et, pt)

    # Tiny non-1024-divisible input (N = 945): pure-epilogue path.
    shape_s = (2, 3, 5, 7, 9)
    es = jax.random.normal(ks[6], shape_s, dtype=jnp.float32)
    ps = jax.random.normal(ks[7], shape_s, dtype=jnp.float32)
    check(es, ps)

    print("KERNEL_OK")
</pallas_src>

<mosaic_0001>
module attributes {stable_mosaic.version = 11 : i64} {
  func.func @_kl_stats_kernel(%arg0: i32, %arg1: i32, %arg2: memref<2x64x128xf32, #tpu.memory_space<vmem>>, %arg3: memref<2x64x128xf32, #tpu.memory_space<vmem>>, %arg4: memref<1x10x8x128xf32, #tpu.memory_space<vmem>>) attributes {dimension_semantics = [#tpu.dimension_semantics<parallel>, #tpu.dimension_semantics<arbitrary>], iteration_bounds = array<i64: 1, 1>, scalar_prefetch = 0 : i64, scratch_operands = 0 : i64, tpu.core_type = #tpu.core_type<tc>, window_params = [{transform_indices = @transform_0, window_bounds = array<i64: 2, 64, 128>}, {transform_indices = @transform_1, window_bounds = array<i64: 2, 64, 128>}, {transform_indices = @transform_2, window_bounds = array<i64: 1, 10, 8, 128>}]} {
    %c0_i32 = arith.constant 0 : i32
    %0 = arith.cmpi eq, %arg1, %c0_i32 : i32
    %1 = arith.extui %0 : i1 to i32
    %c0_i32_0 = arith.constant 0 : i32
    %2 = arith.cmpi ne, %1, %c0_i32_0 : i32
    scf.if %2 {
      %cst = arith.constant -1.000000e+30 : f32
      %219 = vector.broadcast %cst : f32 to vector<2x8x128xf32>
      %cst_126 = arith.constant 0.000000e+00 : f32
      %220 = vector.broadcast %cst_126 : f32 to vector<2x8x128xf32>
      %c0_127 = arith.constant 0 : index
      %c0_128 = arith.constant 0 : index
      %c0_129 = arith.constant 0 : index
      %c0_130 = arith.constant 0 : index
      %221 = vector.load %arg4[%c0_127, %c0_128, %c0_129, %c0_130] : memref<1x10x8x128xf32, #tpu.memory_space<vmem>>, vector<1x2x8x128xf32>
      %222 = vector.shape_cast %221 : vector<1x2x8x128xf32> to vector<2x8x128xf32>
      %223 = vector.shape_cast %219 : vector<2x8x128xf32> to vector<1x2x8x128xf32>
      tpu.vector_store %arg4[%c0_127, %c0_128, %c0_129, %c0_130], %223 {strides = array<i32>} : memref<1x10x8x128xf32, #tpu.memory_space<vmem>>, vector<1x2x8x128xf32>,
      %c0_131 = arith.constant 0 : index
      %c2_132 = arith.constant 2 : index
      %c0_133 = arith.constant 0 : index
      %c0_134 = arith.constant 0 : index
      %224 = vector.load %arg4[%c0_131, %c2_132, %c0_133, %c0_134] : memref<1x10x8x128xf32, #tpu.memory_space<vmem>>, vector<1x2x8x128xf32>
      %225 = vector.shape_cast %224 : vector<1x2x8x128xf32> to vector<2x8x128xf32>
      %226 = vector.shape_cast %220 : vector<2x8x128xf32> to vector<1x2x8x128xf32>
      tpu.vector_store %arg4[%c0_131, %c2_132, %c0_133, %c0_134], %226 {strides = array<i32>} : memref<1x10x8x128xf32, #tpu.memory_space<vmem>>, vector<1x2x8x128xf32>,
      %c0_135 = arith.constant 0 : index
      %c4_136 = arith.constant 4 : index
      %c0_137 = arith.constant 0 : index
      %c0_138 = arith.constant 0 : index
      %227 = vector.load %arg4[%c0_135, %c4_136, %c0_137, %c0_138] : memref<1x10x8x128xf32, #tpu.memory_space<vmem>>, vector<1x2x8x128xf32>
      %228 = vector.shape_cast %227 : vector<1x2x8x128xf32> to vector<2x8x128xf32>
      %229 = vector.shape_cast %220 : vector<2x8x128xf32> to vector<1x2x8x128xf32>
      tpu.vector_store %arg4[%c0_135, %c4_136, %c0_137, %c0_138], %229 {strides = array<i32>} : memref<1x10x8x128xf32, #tpu.memory_space<vmem>>, vector<1x2x8x128xf32>,
      %c0_139 = arith.constant 0 : index
      %c6_140 = arith.constant 6 : index
      %c0_141 = arith.constant 0 : index
      %c0_142 = arith.constant 0 : index
      %230 = vector.load %arg4[%c0_139, %c6_140, %c0_141, %c0_142] : memref<1x10x8x128xf32, #tpu.memory_space<vmem>>, vector<1x2x8x128xf32>
      %231 = vector.shape_cast %230 : vector<1x2x8x128xf32> to vector<2x8x128xf32>
      %232 = vector.shape_cast %219 : vector<2x8x128xf32> to vector<1x2x8x128xf32>
      tpu.vector_store %arg4[%c0_139, %c6_140, %c0_141, %c0_142], %232 {strides = array<i32>} : memref<1x10x8x128xf32, #tpu.memory_space<vmem>>, vector<1x2x8x128xf32>,
      %c0_143 = arith.constant 0 : index
      %c8_144 = arith.constant 8 : index
      %c0_145 = arith.constant 0 : index
      %c0_146 = arith.constant 0 : index
      %233 = vector.load %arg4[%c0_143, %c8_144, %c0_145, %c0_146] : memref<1x10x8x128xf32, #tpu.memory_space<vmem>>, vector<1x2x8x128xf32>
      %234 = vector.shape_cast %233 : vector<1x2x8x128xf32> to vector<2x8x128xf32>
      %235 = vector.shape_cast %220 : vector<2x8x128xf32> to vector<1x2x8x128xf32>
      tpu.vector_store %arg4[%c0_143, %c8_144, %c0_145, %c0_146], %235 {strides = array<i32>} : memref<1x10x8x128xf32, #tpu.memory_space<vmem>>, vector<1x2x8x128xf32>,
    } else {
    }
    %c0 = arith.constant 0 : index
    %c0_1 = arith.constant 0 : index
    %c0_2 = arith.constant 0 : index
    %c0_3 = arith.constant 0 : index
    %3 = vector.load %arg4[%c0, %c0_1, %c0_2, %c0_3] : memref<1x10x8x128xf32, #tpu.memory_space<vmem>>, vector<1x2x8x128xf32>
    %4 = vector.shape_cast %3 : vector<1x2x8x128xf32> to vector<2x8x128xf32>
    %c0_4 = arith.constant 0 : index
    %c2 = arith.constant 2 : index
    %c0_5 = arith.constant 0 : index
    %c0_6 = arith.constant 0 : index
    %5 = vector.load %arg4[%c0_4, %c2, %c0_5, %c0_6] : memref<1x10x8x128xf32, #tpu.memory_space<vmem>>, vector<1x2x8x128xf32>
    %6 = vector.shape_cast %5 : vector<1x2x8x128xf32> to vector<2x8x128xf32>
    %c0_7 = arith.constant 0 : index
    %c4 = arith.constant 4 : index
    %c0_8 = arith.constant 0 : index
    %c0_9 = arith.constant 0 : index
    %7 = vector.load %arg4[%c0_7, %c4, %c0_8, %c0_9] : memref<1x10x8x128xf32, #tpu.memory_space<vmem>>, vector<1x2x8x128xf32>
    %8 = vector.shape_cast %7 : vector<1x2x8x128xf32> to vector<2x8x128xf32>
    %c0_10 = arith.constant 0 : index
    %c6 = arith.constant 6 : index
    %c0_11 = arith.constant 0 : index
    %c0_12 = arith.constant 0 : index
    %9 = vector.load %arg4[%c0_10, %c6, %c0_11, %c0_12] : memref<1x10x8x128xf32, #tpu.memory_space<vmem>>, vector<1x2x8x128xf32>
    %10 = vector.shape_cast %9 : vector<1x2x8x128xf32> to vector<2x8x128xf32>
    %c0_13 = arith.constant 0 : index
    %c8 = arith.constant 8 : index
    %c0_14 = arith.constant 0 : index
    %c0_15 = arith.constant 0 : index
    %11 = vector.load %arg4[%c0_13, %c8, %c0_14, %c0_15] : memref<1x10x8x128xf32, #tpu.memory_space<vmem>>, vector<1x2x8x128xf32>
    %12 = vector.shape_cast %11 : vector<1x2x8x128xf32> to vector<2x8x128xf32>
    %c0_i32_16 = arith.constant 0 : i32
    %c8_i32 = arith.constant 8 : i32
    %13 = arith.muli %c0_i32_16, %c8_i32 : i32
    %14 = tpu.assume_multiple %13, 8 : i32
    %c0_17 = arith.constant 0 : index
    %15 = arith.index_cast %14 : i32 to index
    %c0_18 = arith.constant 0 : index
    %16 = vector.load %arg2[%c0_17, %15, %c0_18] : memref<2x64x128xf32, #tpu.memory_space<vmem>>, vector<2x8x128xf32>
    %c0_19 = arith.constant 0 : index
    %17 = arith.index_cast %14 : i32 to index
    %c0_20 = arith.constant 0 : index
    %18 = vector.load %arg3[%c0_19, %17, %c0_20] : memref<2x64x128xf32, #tpu.memory_space<vmem>>, vector<2x8x128xf32>
    %19 = arith.maximumf %4, %16 : vector<2x8x128xf32>
    %20 = arith.maximumf %10, %18 : vector<2x8x128xf32>
    %c1_i32 = arith.constant 1 : i32
    %c8_i32_21 = arith.constant 8 : i32
    %21 = arith.muli %c1_i32, %c8_i32_21 : i32
    %22 = tpu.assume_multiple %21, 8 : i32
    %c0_22 = arith.constant 0 : index
    %23 = arith.index_cast %22 : i32 to index
    %c0_23 = arith.constant 0 : index
    %24 = vector.load %arg2[%c0_22, %23, %c0_23] : memref<2x64x128xf32, #tpu.memory_space<vmem>>, vector<2x8x128xf32>
    %c0_24 = arith.constant 0 : index
    %25 = arith.index_cast %22 : i32 to index
    %c0_25 = arith.constant 0 : index
    %26 = vector.load %arg3[%c0_24, %25, %c0_25] : memref<2x64x128xf32, #tpu.memory_space<vmem>>, vector<2x8x128xf32>
    %27 = arith.maximumf %19, %24 : vector<2x8x128xf32>
    %28 = arith.maximumf %20, %26 : vector<2x8x128xf32>
    %c2_i32 = arith.constant 2 : i32
    %c8_i32_26 = arith.constant 8 : i32
    %29 = arith.muli %c2_i32, %c8_i32_26 : i32
    %30 = tpu.assume_multiple %29, 8 : i32
    %c0_27 = arith.constant 0 : index
    %31 = arith.index_cast %30 : i32 to index
    %c0_28 = arith.constant 0 : index
    %32 = vector.load %arg2[%c0_27, %31, %c0_28] : memref<2x64x128xf32, #tpu.memory_space<vmem>>, vector<2x8x128xf32>
    %c0_29 = arith.constant 0 : index
    %33 = arith.index_cast %30 : i32 to index
    %c0_30 = arith.constant 0 : index
    %34 = vector.load %arg3[%c0_29, %33, %c0_30] : memref<2x64x128xf32, #tpu.memory_space<vmem>>, vector<2x8x128xf32>
    %35 = arith.maximumf %27, %32 : vector<2x8x128xf32>
    %36 = arith.maximumf %28, %34 : vector<2x8x128xf32>
    %c3_i32 = arith.constant 3 : i32
    %c8_i32_31 = arith.constant 8 : i32
    %37 = arith.muli %c3_i32, %c8_i32_31 : i32
    %38 = tpu.assume_multiple %37, 8 : i32
    %c0_32 = arith.constant 0 : index
    %39 = arith.index_cast %38 : i32 to index
    %c0_33 = arith.constant 0 : index
    %40 = vector.load %arg2[%c0_32, %39, %c0_33] : memref<2x64x128xf32, #tpu.memory_space<vmem>>, vector<2x8x128xf32>
    %c0_34 = arith.constant 0 : index
    %41 = arith.index_cast %38 : i32 to index
    %c0_35 = arith.constant 0 : index
    %42 = vector.load %arg3[%c0_34, %41, %c0_35] : memref<2x64x128xf32, #tpu.memory_space<vmem>>, vector<2x8x128xf32>
    %43 = arith.maximumf %35, %40 : vector<2x8x128xf32>
    %44 = arith.maximumf %36, %42 : vector<2x8x128xf32>
    %c4_i32 = arith.constant 4 : i32
    %c8_i32_36 = arith.constant 8 : i32
    %45 = arith.muli %c4_i32, %c8_i32_36 : i32
    %46 = tpu.assume_multiple %45, 8 : i32
    %c0_37 = arith.constant 0 : index
    %47 = arith.index_cast %46 : i32 to index
    %c0_38 = arith.constant 0 : index
    %48 = vector.load %arg2[%c0_37, %47, %c0_38] : memref<2x64x128xf32, #tpu.memory_space<vmem>>, vector<2x8x128xf32>
    %c0_39 = arith.constant 0 : index
    %49 = arith.index_cast %46 : i32 to index
    %c0_40 = arith.constant 0 : index
    %50 = vector.load %arg3[%c0_39, %49, %c0_40] : memref<2x64x128xf32, #tpu.memory_space<vmem>>, vector<2x8x128xf32>
    %51 = arith.maximumf %43, %48 : vector<2x8x128xf32>
    %52 = arith.maximumf %44, %50 : vector<2x8x128xf32>
    %c5_i32 = arith.constant 5 : i32
    %c8_i32_41 = arith.constant 8 : i32
    %53 = arith.muli %c5_i32, %c8_i32_41 : i32
    %54 = tpu.assume_multiple %53, 8 : i32
    %c0_42 = arith.constant 0 : index
    %55 = arith.index_cast %54 : i32 to index
    %c0_43 = arith.constant 0 : index
    %56 = vector.load %arg2[%c0_42, %55, %c0_43] : memref<2x64x128xf32, #tpu.memory_space<vmem>>, vector<2x8x128xf32>
    %c0_44 = arith.constant 0 : index
    %57 = arith.index_cast %54 : i32 to index
    %c0_45 = arith.constant 0 : index
    %58 = vector.load %arg3[%c0_44, %57, %c0_45] : memref<2x64x128xf32, #tpu.memory_space<vmem>>, vector<2x8x128xf32>
    %59 = arith.maximumf %51, %56 : vector<2x8x128xf32>
    %60 = arith.maximumf %52, %58 : vector<2x8x128xf32>
    %c6_i32 = arith.constant 6 : i32
    %c8_i32_46 = arith.constant 8 : i32
    %61 = arith.muli %c6_i32, %c8_i32_46 : i32
    %62 = tpu.assume_multiple %61, 8 : i32
    %c0_47 = arith.constant 0 : index
    %63 = arith.index_cast %62 : i32 to index
    %c0_48 = arith.constant 0 : index
    %64 = vector.load %arg2[%c0_47, %63, %c0_48] : memref<2x64x128xf32, #tpu.memory_space<vmem>>, vector<2x8x128xf32>
    %c0_49 = arith.constant 0 : index
    %65 = arith.index_cast %62 : i32 to index
    %c0_50 = arith.constant 0 : index
    %66 = vector.load %arg3[%c0_49, %65, %c0_50] : memref<2x64x128xf32, #tpu.memory_space<vmem>>, vector<2x8x128xf32>
    %67 = arith.maximumf %59, %64 : vector<2x8x128xf32>
    %68 = arith.maximumf %60, %66 : vector<2x8x128xf32>
    %c7_i32 = arith.constant 7 : i32
    %c8_i32_51 = arith.constant 8 : i32
    %69 = arith.muli %c7_i32, %c8_i32_51 : i32
    %70 = tpu.assume_multiple %69, 8 : i32
    %c0_52 = arith.constant 0 : index
    %71 = arith.index_cast %70 : i32 to index
    %c0_53 = arith.constant 0 : index
    %72 = vector.load %arg2[%c0_52, %71, %c0_53] : memref<2x64x128xf32, #tpu.memory_space<vmem>>, vector<2x8x128xf32>
    %c0_54 = arith.constant 0 : index
    %73 = arith.index_cast %70 : i32 to index
    %c0_55 = arith.constant 0 : index
    %74 = vector.load %arg3[%c0_54, %73, %c0_55] : memref<2x64x128xf32, #tpu.memory_space<vmem>>, vector<2x8x128xf32>
    %75 = arith.maximumf %67, %72 : vector<2x8x128xf32>
    %76 = arith.maximumf %68, %74 : vector<2x8x128xf32>
    %c8_i32_56 = arith.constant 8 : i32
    %77 = arith.subf %4, %75 : vector<2x8x128xf32>
    %78 = math.exp %77 : vector<2x8x128xf32>
    %79 = arith.subf %10, %76 : vector<2x8x128xf32>
    %80 = math.exp %79 : vector<2x8x128xf32>
    %81 = arith.mulf %78, %6 : vector<2x8x128xf32>
    %82 = arith.mulf %78, %8 : vector<2x8x128xf32>
    %83 = arith.mulf %80, %12 : vector<2x8x128xf32>
    %c0_i32_57 = arith.constant 0 : i32
    %c8_i32_58 = arith.constant 8 : i32
    %84 = arith.muli %c0_i32_57, %c8_i32_58 : i32
    %85 = tpu.assume_multiple %84, 8 : i32
    %c0_59 = arith.constant 0 : index
    %86 = arith.index_cast %85 : i32 to index
    %c0_60 = arith.constant 0 : index
    %87 = vector.load %arg2[%c0_59, %86, %c0_60] : memref<2x64x128xf32, #tpu.memory_space<vmem>>, vector<2x8x128xf32>
    %c0_61 = arith.constant 0 : index
    %88 = arith.index_cast %85 : i32 to index
    %c0_62 = arith.constant 0 : index
    %89 = vector.load %arg3[%c0_61, %88, %c0_62] : memref<2x64x128xf32, #tpu.memory_space<vmem>>, vector<2x8x128xf32>
    %90 = arith.subf %87, %75 : vector<2x8x128xf32>
    %91 = math.exp %90 : vector<2x8x128xf32>
    %92 = arith.subf %89, %76 : vector<2x8x128xf32>
    %93 = math.exp %92 : vector<2x8x128xf32>
    %94 = arith.subf %87, %89 : vector<2x8x128xf32>
    %95 = arith.mulf %91, %94 : vector<2x8x128xf32>
    %96 = arith.addf %81, %91 : vector<2x8x128xf32>
    %97 = arith.addf %82, %95 : vector<2x8x128xf32>
    %98 = arith.addf %83, %93 : vector<2x8x128xf32>
    %c1_i32_63 = arith.constant 1 : i32
    %c8_i32_64 = arith.constant 8 : i32
    %99 = arith.muli %c1_i32_63, %c8_i32_64 : i32
    %100 = tpu.assume_multiple %99, 8 : i32
    %c0_65 = arith.constant 0 : index
    %101 = arith.index_cast %100 : i32 to index
    %c0_66 = arith.constant 0 : index
    %102 = vector.load %arg2[%c0_65, %101, %c0_66] : memref<2x64x128xf32, #tpu.memory_space<vmem>>, vector<2x8x128xf32>
    %c0_67 = arith.constant 0 : index
    %103 = arith.index_cast %100 : i32 to index
    %c0_68 = arith.constant 0 : index
    %104 = vector.load %arg3[%c0_67, %103, %c0_68] : memref<2x64x128xf32, #tpu.memory_space<vmem>>, vector<2x8x128xf32>
    %105 = arith.subf %102, %75 : vector<2x8x128xf32>
    %106 = math.exp %105 : vector<2x8x128xf32>
    %107 = arith.subf %104, %76 : vector<2x8x128xf32>
    %108 = math.exp %107 : vector<2x8x128xf32>
    %109 = arith.subf %102, %104 : vector<2x8x128xf32>
    %110 = arith.mulf %106, %109 : vector<2x8x128xf32>
    %111 = arith.addf %96, %106 : vector<2x8x128xf32>
    %112 = arith.addf %97, %110 : vector<2x8x128xf32>
    %113 = arith.addf %98, %108 : vector<2x8x128xf32>
    %c2_i32_69 = arith.constant 2 : i32
    %c8_i32_70 = arith.constant 8 : i32
    %114 = arith.muli %c2_i32_69, %c8_i32_70 : i32
    %115 = tpu.assume_multiple %114, 8 : i32
    %c0_71 = arith.constant 0 : index
    %116 = arith.index_cast %115 : i32 to index
    %c0_72 = arith.constant 0 : index
    %117 = vector.load %arg2[%c0_71, %116, %c0_72] : memref<2x64x128xf32, #tpu.memory_space<vmem>>, vector<2x8x128xf32>
    %c0_73 = arith.constant 0 : index
    %118 = arith.index_cast %115 : i32 to index
    %c0_74 = arith.constant 0 : index
    %119 = vector.load %arg3[%c0_73, %118, %c0_74] : memref<2x64x128xf32, #tpu.memory_space<vmem>>, vector<2x8x128xf32>
    %120 = arith.subf %117, %75 : vector<2x8x128xf32>
    %121 = math.exp %120 : vector<2x8x128xf32>
    %122 = arith.subf %119, %76 : vector<2x8x128xf32>
    %123 = math.exp %122 : vector<2x8x128xf32>
    %124 = arith.subf %117, %119 : vector<2x8x128xf32>
    %125 = arith.mulf %121, %124 : vector<2x8x128xf32>
    %126 = arith.addf %111, %121 : vector<2x8x128xf32>
    %127 = arith.addf %112, %125 : vector<2x8x128xf32>
    %128 = arith.addf %113, %123 : vector<2x8x128xf32>
    %c3_i32_75 = arith.constant 3 : i32
    %c8_i32_76 = arith.constant 8 : i32
    %129 = arith.muli %c3_i32_75, %c8_i32_76 : i32
    %130 = tpu.assume_multiple %129, 8 : i32
    %c0_77 = arith.constant 0 : index
    %131 = arith.index_cast %130 : i32 to index
    %c0_78 = arith.constant 0 : index
    %132 = vector.load %arg2[%c0_77, %131, %c0_78] : memref<2x64x128xf32, #tpu.memory_space<vmem>>, vector<2x8x128xf32>
    %c0_79 = arith.constant 0 : index
    %133 = arith.index_cast %130 : i32 to index
    %c0_80 = arith.constant 0 : index
    %134 = vector.load %arg3[%c0_79, %133, %c0_80] : memref<2x64x128xf32, #tpu.memory_space<vmem>>, vector<2x8x128xf32>
    %135 = arith.subf %132, %75 : vector<2x8x128xf32>
    %136 = math.exp %135 : vector<2x8x128xf32>
    %137 = arith.subf %134, %76 : vector<2x8x128xf32>
    %138 = math.exp %137 : vector<2x8x128xf32>
    %139 = arith.subf %132, %134 : vector<2x8x128xf32>
    %140 = arith.mulf %136, %139 : vector<2x8x128xf32>
    %141 = arith.addf %126, %136 : vector<2x8x128xf32>
    %142 = arith.addf %127, %140 : vector<2x8x128xf32>
    %143 = arith.addf %128, %138 : vector<2x8x128xf32>
    %c4_i32_81 = arith.constant 4 : i32
    %c8_i32_82 = arith.constant 8 : i32
    %144 = arith.muli %c4_i32_81, %c8_i32_82 : i32
    %145 = tpu.assume_multiple %144, 8 : i32
    %c0_83 = arith.constant 0 : index
    %146 = arith.index_cast %145 : i32 to index
    %c0_84 = arith.constant 0 : index
    %147 = vector.load %arg2[%c0_83, %146, %c0_84] : memref<2x64x128xf32, #tpu.memory_space<vmem>>, vector<2x8x128xf32>
    %c0_85 = arith.constant 0 : index
    %148 = arith.index_cast %145 : i32 to index
    %c0_86 = arith.constant 0 : index
    %149 = vector.load %arg3[%c0_85, %148, %c0_86] : memref<2x64x128xf32, #tpu.memory_space<vmem>>, vector<2x8x128xf32>
    %150 = arith.subf %147, %75 : vector<2x8x128xf32>
    %151 = math.exp %150 : vector<2x8x128xf32>
    %152 = arith.subf %149, %76 : vector<2x8x128xf32>
    %153 = math.exp %152 : vector<2x8x128xf32>
    %154 = arith.subf %147, %149 : vector<2x8x128xf32>
    %155 = arith.mulf %151, %154 : vector<2x8x128xf32>
    %156 = arith.addf %141, %151 : vector<2x8x128xf32>
    %157 = arith.addf %142, %155 : vector<2x8x128xf32>
    %158 = arith.addf %143, %153 : vector<2x8x128xf32>
    %c5_i32_87 = arith.constant 5 : i32
    %c8_i32_88 = arith.constant 8 : i32
    %159 = arith.muli %c5_i32_87, %c8_i32_88 : i32
    %160 = tpu.assume_multiple %159, 8 : i32
    %c0_89 = arith.constant 0 : index
    %161 = arith.index_cast %160 : i32 to index
    %c0_90 = arith.constant 0 : index
    %162 = vector.load %arg2[%c0_89, %161, %c0_90] : memref<2x64x128xf32, #tpu.memory_space<vmem>>, vector<2x8x128xf32>
    %c0_91 = arith.constant 0 : index
    %163 = arith.index_cast %160 : i32 to index
    %c0_92 = arith.constant 0 : index
    %164 = vector.load %arg3[%c0_91, %163, %c0_92] : memref<2x64x128xf32, #tpu.memory_space<vmem>>, vector<2x8x128xf32>
    %165 = arith.subf %162, %75 : vector<2x8x128xf32>
    %166 = math.exp %165 : vector<2x8x128xf32>
    %167 = arith.subf %164, %76 : vector<2x8x128xf32>
    %168 = math.exp %167 : vector<2x8x128xf32>
    %169 = arith.subf %162, %164 : vector<2x8x128xf32>
    %170 = arith.mulf %166, %169 : vector<2x8x128xf32>
    %171 = arith.addf %156, %166 : vector<2x8x128xf32>
    %172 = arith.addf %157, %170 : vector<2x8x128xf32>
    %173 = arith.addf %158, %168 : vector<2x8x128xf32>
    %c6_i32_93 = arith.constant 6 : i32
    %c8_i32_94 = arith.constant 8 : i32
    %174 = arith.muli %c6_i32_93, %c8_i32_94 : i32
    %175 = tpu.assume_multiple %174, 8 : i32
    %c0_95 = arith.constant 0 : index
    %176 = arith.index_cast %175 : i32 to index
    %c0_96 = arith.constant 0 : index
    %177 = vector.load %arg2[%c0_95, %176, %c0_96] : memref<2x64x128xf32, #tpu.memory_space<vmem>>, vector<2x8x128xf32>
    %c0_97 = arith.constant 0 : index
    %178 = arith.index_cast %175 : i32 to index
    %c0_98 = arith.constant 0 : index
    %179 = vector.load %arg3[%c0_97, %178, %c0_98] : memref<2x64x128xf32, #tpu.memory_space<vmem>>, vector<2x8x128xf32>
    %180 = arith.subf %177, %75 : vector<2x8x128xf32>
    %181 = math.exp %180 : vector<2x8x128xf32>
    %182 = arith.subf %179, %76 : vector<2x8x128xf32>
    %183 = math.exp %182 : vector<2x8x128xf32>
    %184 = arith.subf %177, %179 : vector<2x8x128xf32>
    %185 = arith.mulf %181, %184 : vector<2x8x128xf32>
    %186 = arith.addf %171, %181 : vector<2x8x128xf32>
    %187 = arith.addf %172, %185 : vector<2x8x128xf32>
    %188 = arith.addf %173, %183 : vector<2x8x128xf32>
    %c7_i32_99 = arith.constant 7 : i32
    %c8_i32_100 = arith.constant 8 : i32
    %189 = arith.muli %c7_i32_99, %c8_i32_100 : i32
    %190 = tpu.assume_multiple %189, 8 : i32
    %c0_101 = arith.constant 0 : index
    %191 = arith.index_cast %190 : i32 to index
    %c0_102 = arith.constant 0 : index
    %192 = vector.load %arg2[%c0_101, %191, %c0_102] : memref<2x64x128xf32, #tpu.memory_space<vmem>>, vector<2x8x128xf32>
    %c0_103 = arith.constant 0 : index
    %193 = arith.index_cast %190 : i32 to index
    %c0_104 = arith.constant 0 : index
    %194 = vector.load %arg3[%c0_103, %193, %c0_104] : memref<2x64x128xf32, #tpu.memory_space<vmem>>, vector<2x8x128xf32>
    %195 = arith.subf %192, %75 : vector<2x8x128xf32>
    %196 = math.exp %195 : vector<2x8x128xf32>
    %197 = arith.subf %194, %76 : vector<2x8x128xf32>
    %198 = math.exp %197 : vector<2x8x128xf32>
    %199 = arith.subf %192, %194 : vector<2x8x128xf32>
    %200 = arith.mulf %196, %199 : vector<2x8x128xf32>
    %201 = arith.addf %186, %196 : vector<2x8x128xf32>
    %202 = arith.addf %187, %200 : vector<2x8x128xf32>
    %203 = arith.addf %188, %198 : vector<2x8x128xf32>
    %c8_i32_105 = arith.constant 8 : i32
    %c0_106 = arith.constant 0 : index
    %c0_107 = arith.constant 0 : index
    %c0_108 = arith.constant 0 : index
    %c0_109 = arith.constant 0 : index
    %204 = vector.load %arg4[%c0_106, %c0_107, %c0_108, %c0_109] : memref<1x10x8x128xf32, #tpu.memory_space<vmem>>, vector<1x2x8x128xf32>
    %205 = vector.shape_cast %204 : vector<1x2x8x128xf32> to vector<2x8x128xf32>
    %206 = vector.shape_cast %75 : vector<2x8x128xf32> to vector<1x2x8x128xf32>
    tpu.vector_store %arg4[%c0_106, %c0_107, %c0_108, %c0_109], %206 {strides = array<i32>} : memref<1x10x8x128xf32, #tpu.memory_space<vmem>>, vector<1x2x8x128xf32>,
    %c0_110 = arith.constant 0 : index
    %c2_111 = arith.constant 2 : index
    %c0_112 = arith.constant 0 : index
    %c0_113 = arith.constant 0 : index
    %207 = vector.load %arg4[%c0_110, %c2_111, %c0_112, %c0_113] : memref<1x10x8x128xf32, #tpu.memory_space<vmem>>, vector<1x2x8x128xf32>
    %208 = vector.shape_cast %207 : vector<1x2x8x128xf32> to vector<2x8x128xf32>
    %209 = vector.shape_cast %201 : vector<2x8x128xf32> to vector<1x2x8x128xf32>
    tpu.vector_store %arg4[%c0_110, %c2_111, %c0_112, %c0_113], %209 {strides = array<i32>} : memref<1x10x8x128xf32, #tpu.memory_space<vmem>>, vector<1x2x8x128xf32>,
    %c0_114 = arith.constant 0 : index
    %c4_115 = arith.constant 4 : index
    %c0_116 = arith.constant 0 : index
    %c0_117 = arith.constant 0 : index
    %210 = vector.load %arg4[%c0_114, %c4_115, %c0_116, %c0_117] : memref<1x10x8x128xf32, #tpu.memory_space<vmem>>, vector<1x2x8x128xf32>
    %211 = vector.shape_cast %210 : vector<1x2x8x128xf32> to vector<2x8x128xf32>
    %212 = vector.shape_cast %202 : vector<2x8x128xf32> to vector<1x2x8x128xf32>
    tpu.vector_store %arg4[%c0_114, %c4_115, %c0_116, %c0_117], %212 {strides = array<i32>} : memref<1x10x8x128xf32, #tpu.memory_space<vmem>>, vector<1x2x8x128xf32>,
    %c0_118 = arith.constant 0 : index
    %c6_119 = arith.constant 6 : index
    %c0_120 = arith.constant 0 : index
    %c0_121 = arith.constant 0 : index
    %213 = vector.load %arg4[%c0_118, %c6_119, %c0_120, %c0_121] : memref<1x10x8x128xf32, #tpu.memory_space<vmem>>, vector<1x2x8x128xf32>
    %214 = vector.shape_cast %213 : vector<1x2x8x128xf32> to vector<2x8x128xf32>
    %215 = vector.shape_cast %76 : vector<2x8x128xf32> to vector<1x2x8x128xf32>
    tpu.vector_store %arg4[%c0_118, %c6_119, %c0_120, %c0_121], %215 {strides = array<i32>} : memref<1x10x8x128xf32, #tpu.memory_space<vmem>>, vector<1x2x8x128xf32>,
    %c0_122 = arith.constant 0 : index
    %c8_123 = arith.constant 8 : index
    %c0_124 = arith.constant 0 : index
    %c0_125 = arith.constant 0 : index
    %216 = vector.load %arg4[%c0_122, %c8_123, %c0_124, %c0_125] : memref<1x10x8x128xf32, #tpu.memory_space<vmem>>, vector<1x2x8x128xf32>
    %217 = vector.shape_cast %216 : vector<1x2x8x128xf32> to vector<2x8x128xf32>
    %218 = vector.shape_cast %203 : vector<2x8x128xf32> to vector<1x2x8x128xf32>
    tpu.vector_store %arg4[%c0_122, %c8_123, %c0_124, %c0_125], %218 {strides = array<i32>} : memref<1x10x8x128xf32, #tpu.memory_space<vmem>>, vector<1x2x8x128xf32>,
    return
  }
  func.func @transform_0(%arg0: i32, %arg1: i32) -> (i32, i32, i32) {
    %c1_i32 = arith.constant 1 : i32
    %0 = arith.muli %arg0, %c1_i32 : i32
    %1 = arith.addi %0, %arg1 : i32
    %c0_i32 = arith.constant 0 : i32
    %2 = arith.minsi %1, %c0_i32 : i32
    %c0_i32_0 = arith.constant 0 : i32
    %c0_i32_1 = arith.constant 0 : i32
    %c0_i32_2 = arith.constant 0 : i32
    return %c0_i32_0, %2, %c0_i32_1 : i32, i32, i32
  }
  func.func @transform_1(%arg0: i32, %arg1: i32) -> (i32, i32, i32) {
    %c1_i32 = arith.constant 1 : i32
    %0 = arith.muli %arg0, %c1_i32 : i32
    %1 = arith.addi %0, %arg1 : i32
    %c0_i32 = arith.constant 0 : i32
    %2 = arith.minsi %1, %c0_i32 : i32
    %c0_i32_0 = arith.constant 0 : i32
    %c0_i32_1 = arith.constant 0 : i32
    %c0_i32_2 = arith.constant 0 : i32
    return %c0_i32_0, %2, %c0_i32_1 : i32, i32, i32
  }
  func.func @transform_2(%arg0: i32, %arg1: i32) -> (i32, i32, i32, i32) {
    %c0_i32 = arith.constant 0 : i32
    %c0_i32_0 = arith.constant 0 : i32
    %c0_i32_1 = arith.constant 0 : i32
    %c0_i32_2 = arith.constant 0 : i32
    return %arg0, %c0_i32, %c0_i32_0, %c0_i32_1 : i32, i32, i32, i32
  }
}

</mosaic_0001>

<bundles_post_ra>
// kernel: tpu_custom_call.1
= control target key start
LH: loop header
LB: loop body
LE: loop exit
PB: predicated region body
PF: predicated region fallthrough
CT: control target
= control target key end

     0   :  { %7 = vsyncpa [#allocation3], 0  ;;  %s877_s0 = inlined_call_operand.hbm [shape: f32[2,64,128], index: 0, kind: input, shape index: {}]   ;;  %s878_s1 = inlined_call_operand.hbm [shape: f32[2,64,128], index: 1, kind: input, shape index: {}]   ;;  %s879_s2 = inlined_call_operand.hbm [shape: f32[1,10,8,128], index: 2, kind: output, shape index: {}]  }
   0x1   :  { %8 = vsyncpa [#allocation6], 0 }
   0x2   :  { %9 = vsyncpa [#allocation4], 0  ;;  %s547_s9 = smov [#allocation2]   ;;  %s475_s13 = scalar_lea.hbm %s877_s0, 2048 }
   0x3   :  { %s21_s10 = sshll.u32 %s547_s9, 4  ;;  %p476_p0 = scmp.ne.s32.totalorder %s877_s0, %s475_s13  ;;  %s22_s10 = int_to_ptr.vmem [resolvable:$true] %s21_s10 }
   0x4   :  { %p479_p1 = scmp.lt.u32.totalorder %s475_s13, %s877_s0 }
   0x6   :  { %p481_p2 = pnand %p479_p1, %p476_p0 }
   0x8   :  { %484 = shalt.err (!%p481_p2)
}
   0x9   :  { %s485_s18 = scalar_lea.vmem %s22_s10, 2048  ;;  %p490_p4 = scmp.lt.s32.totalorder %s22_s10, %s22_s10 }
   0xa   :  { %p486_p3 = scmp.ne.s32.totalorder %s22_s10, %s485_s18  ;;  %p491_p5 = scmp.lt.s32.totalorder %s485_s18, %s485_s18 }
   0xc   :  { %p492_p6 = por %p491_p5, %p490_p4 }
   0xe   :  { %p493_p7 = pnand %p492_p6, %p486_p3 }
  0x10   :  { %496 = shalt.err (!%p493_p7)
}
  0x11   :  { %s548_s19 = smov 128   ;;  %s549_s20 = smov 8  }
  0x12   :  { %27 = dma.hbm_to_vmem [thread:$0]  %s877_s0, 2048, %s22_s10, [#allocation3], %s548_s19, %s548_s19, %s549_s20  }
  0x13   :  { %s550_s23 = smov [#allocation5]   ;;  %s497_s27 = scalar_lea.hbm %s878_s1, 2048 }
  0x14   :  { %s39_s24 = sshll.u32 %s550_s23, 4  ;;  %p498_p8 = scmp.ne.s32.totalorder %s878_s1, %s497_s27  ;;  %s40_s24 = int_to_ptr.vmem [resolvable:$true] %s39_s24 }
  0x15   :  { %p501_p9 = scmp.lt.u32.totalorder %s497_s27, %s878_s1 }
  0x17   :  { %p503_p10 = pnand %p501_p9, %p498_p8 }
  0x19   :  { %506 = shalt.err (!%p503_p10)
}
  0x1a   :  { %s507_s4 = scalar_lea.vmem %s40_s24, 2048  ;;  %p512_p12 = scmp.lt.s32.totalorder %s40_s24, %s40_s24 }
  0x1b   :  { %p508_p11 = scmp.ne.s32.totalorder %s40_s24, %s507_s4  ;;  %p513_p13 = scmp.lt.s32.totalorder %s507_s4, %s507_s4 }
  0x1d   :  { %p514_p0 = por %p513_p13, %p512_p12 }
  0x1f   :  { %p515_p1 = pnand %p514_p0, %p508_p11 }
  0x21   :  { %518 = shalt.err (!%p515_p1)
}
  0x22   :  { %45 = dma.hbm_to_vmem [thread:$0]  %s878_s1, 2048, %s40_s24, [#allocation6], %s548_s19, %s548_s19, %s549_s20  }
  0x23   :  { %541 = dma.done.wait [#allocation3], 2048  }
  0x24   :  { %542 = vsyncadd [#allocation3], 4294965248 }
  0x25   :  { %543 = dma.done.wait [#allocation6], 2048  }
  0x26   :  { %544 = vsyncadd [#allocation6], 4294965248  ;;  %v597_v0 = vld [vmem:[#allocation2] sm:$0xff]  ;;  %v599_v1 = vld [vmem:[#allocation2 + $0x8] sm:$0xff]  ;;  %s551_s1 = smov [#allocation7]  }
  0x27   :  { %v96_v2 = vmax.f32 %v597_v0, -1e+30  ;;  %v602_v3 = vld [vmem:[#allocation2 + $0x10] sm:$0xff]  ;;  %v604_v4 = vld [vmem:[#allocation2 + $0x40] sm:$0xff]  ;;  %v608_v7 = vld [vmem:[#allocation2 + $0x48] sm:$0xff]  ;;  %s379_s6 = sshll.u32 %s551_s1, 4  ;;  %s380_s6 = int_to_ptr.vmem [resolvable:$true] %s379_s6 }
  0x28   :  { %v97_v6 = vmax.f32 %v604_v4, -1e+30  ;;  %v610_v8 = vld [vmem:[#allocation2 + $0x18] sm:$0xff]  ;;  %v612_v9 = vld [vmem:[#allocation2 + $0x50] sm:$0xff]  ;;  %v616_v12 = vld [vmem:[#allocation5] sm:$0xff]  ;;  %s519_s7 = scalar_lea.vmem %s380_s6, 1280  ;;  %p524_p3 = scmp.lt.s32.totalorder %s380_s6, %s380_s6 }
  0x29   :  { %v106_v5 = vmax.f32 %v96_v2, %v599_v1  ;;  %v618_v13 = vld [vmem:[#allocation5 + $0x8] sm:$0xff]  ;;  %v620_v14 = vld [vmem:[#allocation2 + $0x20] sm:$0xff]  ;;  %v622_v15 = vld [vmem:[#allocation2 + $0x58] sm:$0xff]  ;;  %v98_v16 = vmax.f32 %v616_v12, -1e+30  ;;  %v200_v42 = vsub.f32 %v597_v0, %v616_v12  ;;  %p520_p2 = scmp.ne.s32.totalorder %s380_s6, %s519_s7  ;;  %p525_p4 = scmp.lt.s32.totalorder %s519_s7, %s519_s7 }
  0x2a   :  { %v107_v11 = vmax.f32 %v97_v6, %v608_v7  ;;  %v627_v19 = vld [vmem:[#allocation5 + $0x10] sm:$0xff]  ;;  %v629_v20 = vld [vmem:[#allocation2 + $0x28] sm:$0xff]  ;;  %v631_v21 = vld [vmem:[#allocation2 + $0x60] sm:$0xff]  ;;  %v222_v43 = vsub.f32 %v599_v1, %v618_v13 }
  0x2b   :  { %v116_v10 = vmax.f32 %v106_v5, %v602_v3  ;;  %v108_v22 = vmax.f32 %v98_v16, %v618_v13  ;;  %v634_v23 = vld [vmem:[#allocation5 + $0x40] sm:$0xff]  ;;  %v638_v26 = vld [vmem:[#allocation5 + $0x18] sm:$0xff]  ;;  %v641_v28 = vld [vmem:[#allocation5 + $0x48] sm:$0xff]  ;;  %v244_v47 = vsub.f32 %v602_v3, %v627_v19  ;;  %p526_p5 = por %p525_p4, %p524_p3 }
  0x2c   :  { %v117_v18 = vmax.f32 %v107_v11, %v612_v9  ;;  %v99_v27 = vmax.f32 %v634_v23, -1e+30  ;;  %v643_v29 = vld [vmem:[#allocation2 + $0x30] sm:$0xff]  ;;  %v645_v30 = vld [vmem:[#allocation2 + $0x68] sm:$0xff]  ;;  %v650_v34 = vld [vmem:[#allocation5 + $0x20] sm:$0xff] }
  0x2d   :  { %v126_v17 = vmax.f32 %v116_v10, %v610_v8  ;;  %v118_v31 = vmax.f32 %v108_v22, %v627_v19  ;;  %v652_v35 = vld [vmem:[#allocation2 + $0x38] sm:$0xff]  ;;  %v654_v36 = vld [vmem:[#allocation2 + $0x70] sm:$0xff]  ;;  %v660_v41 = vld [vmem:[#allocation5 + $0x28] sm:$0xff]  ;;  %p527_p6 = pnand %p526_p5, %p520_p2 }
  0x2e   :  { %v127_v25 = vmax.f32 %v117_v18, %v622_v15  ;;  %v109_v38 = vmax.f32 %v99_v27, %v641_v28  ;;  %v666_v44 = vld [vmem:[#allocation5 + $0x50] sm:$0xff]  ;;  %v681_v52 = vld [vmem:[#allocation2 + $0x78] sm:$0xff] }
  0x2f   :  { %v136_v24 = vmax.f32 %v126_v17, %v620_v14  ;;  %v128_v37 = vmax.f32 %v118_v31, %v638_v26  ;;  %v669_v46 = vld [vmem:[#allocation5 + $0x30] sm:$0xff]  ;;  %v701_v63 = vld [vmem:[#allocation5 + $0x58] sm:$0xff] }
  0x30   :  { %v137_v33 = vmax.f32 %v127_v25, %v631_v21  ;;  %v119_v56 = vmax.f32 %v109_v38, %v666_v44  ;;  %v758_v54 = vld [vmem:[#allocation5 + $0x70] sm:$0xff] }
  0x31   :  { %v146_v32 = vmax.f32 %v136_v24, %v629_v20  ;;  %v138_v45 = vmax.f32 %v128_v37, %v650_v34 }
  0x32   :  { %v147_v40 = vmax.f32 %v137_v33, %v645_v30  ;;  %v129_v25 = vmax.f32 %v119_v56, %v701_v63 }
  0x33   :  { %v156_v39 = vmax.f32 %v146_v32, %v643_v29  ;;  %v148_v55 = vmax.f32 %v138_v45, %v660_v41  ;;  %v728_v45 = vld [vmem:[#allocation5 + $0x60] sm:$0xff] }
  0x34   :  { %v157_v51 = vmax.f32 %v147_v40, %v654_v36  ;;  %v726_v40 = vld [vmem:[#allocation5 + $0x38] sm:$0xff] }
  0x35   :  { %v678_v50 = vmax.f32 %v156_v39, %v652_v35  ;;  %v158_v33 = vmax.f32 %v148_v55, %v669_v46 }
  0x36   :  { %v708_v6 = vmax.f32 %v157_v51, %v681_v52  ;;  %v730_v51 = vld [vmem:[#allocation5 + $0x68] sm:$0xff] }
  0x37   :  { %v170_v59 = vsub.f32 -1e+30, %v678_v50  ;;  %v188_v60 = vsub.f32 %v597_v0, %v678_v50  ;;  %v210_v61 = vsub.f32 %v599_v1, %v678_v50  ;;  %v232_v62 = vsub.f32 %v602_v3, %v678_v50  ;;  %364 = vst [vmem:[#allocation7] sm:$0xff] %v678_v50 }
  0x38   :  { %v254_v2 = vsub.f32 %v610_v8, %v678_v50  ;;  %v276_v5 = vsub.f32 %v620_v14, %v678_v50  ;;  %v298_v18 = vsub.f32 %v629_v20, %v678_v50  ;;  %v171_v24 = vsub.f32 -1e+30, %v708_v6  ;;  %365 = vst [vmem:[#allocation7 + $0x8] sm:$0xff] %v708_v6 }
  0x39   :  { %v172_v11 = vmul.f32 1.442695, %v170_v59  ;;  %v190_v16 = vmul.f32 1.442695, %v188_v60  ;;  %v212_v17 = vmul.f32 1.442695, %v210_v61  ;;  %v189_v32 = vsub.f32 %v604_v4, %v708_v6 }
  0x3a   :  { %v234_v22 = vmul.f32 1.442695, %v232_v62  ;;  %v256_v31 = vmul.f32 1.442695, %v254_v2  ;;  %v278_v37 = vmul.f32 1.442695, %v276_v5  ;;  %v211_v38 = vsub.f32 %v608_v7, %v708_v6 }
  0x3b   :  { %403 = vpow2.f32 %v172_v11  ;;  %v233_v39 = vsub.f32 %v612_v9, %v708_v6  ;;  %v300_v56 = vmul.f32 1.442695, %v298_v18  ;;  %v174_v60 = vmul.f32 1.442695, %v171_v24 }
  0x3c   :  { %405 = vpow2.f32 %v190_v16  ;;  %v255_v61 = vsub.f32 %v622_v15, %v708_v6  ;;  %v277_v62 = vsub.f32 %v631_v21, %v708_v6  ;;  %v192_v2 = vmul.f32 1.442695, %v189_v32 }
  0x3d   :  { %407 = vpow2.f32 %v212_v17  ;;  %v299_v5 = vsub.f32 %v645_v30, %v708_v6  ;;  %v743_v11 = vmax.f32 %v158_v33, %v726_v40  ;;  %v214_v16 = vmul.f32 1.442695, %v211_v38 }
  0x3e   :  { %409 = vpow2.f32 %v234_v22  ;;  %v236_v17 = vmul.f32 1.442695, %v233_v39  ;;  %v139_v18 = vmax.f32 %v129_v25, %v728_v45  ;;  %v258_v32 = vmul.f32 1.442695, %v255_v61 }
  0x3f   :  { %411 = vpow2.f32 %v256_v31  ;;  %v176_v22 = vsub.f32 -1e+30, %v743_v11  ;;  %v194_v24 = vsub.f32 %v616_v12, %v743_v11  ;;  %v216_v31 = vsub.f32 %v618_v13, %v743_v11  ;;  %370 = vst [vmem:[#allocation7 + $0x30] sm:$0xff] %v743_v11 }
  0x40   :  { %413 = vpow2.f32 %v278_v37  ;;  %v280_v33 = vmul.f32 1.442695, %v277_v62  ;;  %v238_v37 = vsub.f32 %v627_v19, %v743_v11  ;;  %v302_v38 = vmul.f32 1.442695, %v299_v5 }
  0x41   :  { %415 = vpow2.f32 %v300_v56  ;;  %v260_v25 = vsub.f32 %v638_v26, %v743_v11  ;;  %v282_v39 = vsub.f32 %v650_v34, %v743_v11  ;;  %v178_v56 = vmul.f32 1.442695, %v176_v22  ;;  %v767_v22 = vld [vmem:[#allocation5 + $0x78] sm:$0xff] }
  0x42   :  { %417 = vpow2.f32 %v174_v60  ;;  %v320_v60 = vsub.f32 %v643_v29, %v678_v50  ;;  %v342_v61 = vsub.f32 %v652_v35, %v678_v50  ;;  %v218_v5 = vmul.f32 1.442695, %v216_v31 }
  0x43   :  { %419 = vpow2.f32 %v192_v2  ;;  %v196_v2 = vmul.f32 1.442695, %v194_v24  ;;  %v149_v55 = vmax.f32 %v139_v18, %v730_v51  ;;  %v240_v27 = vmul.f32 1.442695, %v238_v37 }
  0x44   :  { %421 = vpow2.f32 %v214_v16  ;;  %v304_v16 = vsub.f32 %v660_v41, %v743_v11  ;;  %v262_v10 = vmul.f32 1.442695, %v260_v25  ;;  %v284_v58 = vmul.f32 1.442695, %v282_v39 }
  0x45   :  { %v404_v62 = vpop.eup %403  ;;  %423 = vpow2.f32 %v236_v17  ;;  %v159_v50 = vmax.f32 %v149_v55, %v758_v54  ;;  %v770_v31 = vmul.f32 1.442695, %v320_v60  ;;  %v343_v57 = vsub.f32 %v681_v52, %v708_v6 }
  0x46   :  { %v406_v59 = vpop.eup %405  ;;  %425 = vpow2.f32 %v258_v32  ;;  %v182_v53 = vmul.f32 0.0, %v404_v62  ;;  %v778_v62 = vmul.f32 1.442695, %v342_v61  ;;  %v880_v3 = vsub.f32 %v610_v8, %v638_v26 }
  0x47   :  { %v408_v49 = vpop.eup %407  ;;  %427 = vpow2.f32 %v280_v33  ;;  %v202_v18 = vmul.f32 %v406_v59, %v200_v42  ;;  %v776_v37 = vmax.f32 %v159_v50, %v767_v22  ;;  %v321_v33 = vsub.f32 %v654_v36, %v708_v6 }
  0x48   :  { %v410_v17 = vpop.eup %409  ;;  %429 = vpow2.f32 %v302_v38  ;;  %v204_v24 = vadd.f32 %v406_v59, %v182_v53  ;;  %v306_v38 = vmul.f32 1.442695, %v304_v16  ;;  %v224_v0 = vmul.f32 %v408_v49, %v222_v43 }
  0x49   :  { %v412_v32 = vpop.eup %411  ;;  %431 = vpow2.f32 %v178_v56  ;;  %v177_v42 = vsub.f32 -1e+30, %v776_v37  ;;  %v195_v59 = vsub.f32 %v634_v23, %v776_v37  ;;  %v217_v39 = vsub.f32 %v641_v28, %v776_v37  ;;  %371 = vst [vmem:[#allocation7 + $0x38] sm:$0xff] %v776_v37 }
  0x4a   :  { %v782_v55 = vpop.eup %413  ;;  %433 = vpow2.f32 %v196_v2  ;;  %v226_v25 = vadd.f32 %v408_v49, %v204_v24  ;;  %v239_v60 = vsub.f32 %v666_v44, %v776_v37  ;;  %v261_v1 = vsub.f32 %v701_v63, %v776_v37 }
  0x4b   :  { %v787_v12 = vpop.eup %415  ;;  %435 = vpow2.f32 %v218_v5  ;;  %v206_v13 = vadd.f32 %v202_v18, %v182_v53  ;;  %v180_v49 = vmul.f32 1.442695, %v177_v42  ;;  %v198_v61 = vmul.f32 1.442695, %v195_v59 }
  0x4c   :  { %v418_v56 = vpop.eup %417  ;;  %437 = vpow2.f32 %v240_v27  ;;  %v283_v2 = vsub.f32 %v728_v45, %v776_v37  ;;  %v220_v16 = vmul.f32 1.442695, %v217_v39  ;;  %v242_v50 = vmul.f32 1.442695, %v239_v60 }
  0x4d   :  { %v420_v43 = vpop.eup %419  ;;  %439 = vpow2.f32 %v262_v10  ;;  %v246_v27 = vmul.f32 %v410_v17, %v244_v47  ;;  %v305_v53 = vsub.f32 %v730_v51, %v776_v37  ;;  %v248_v18 = vadd.f32 %v410_v17, %v226_v25 }
  0x4e   :  { %v422_v5 = vpop.eup %421  ;;  %441 = vpow2.f32 %v284_v58  ;;  %v183_v10 = vmul.f32 0.0, %v418_v56  ;;  %v264_v59 = vmul.f32 1.442695, %v261_v1  ;;  %v228_v58 = vadd.f32 %v224_v0, %v206_v13 }
  0x4f   :  { %v424_v24 = vpop.eup %423  ;;  %443 = vpow2.f32 %v306_v38  ;;  %v286_v60 = vmul.f32 1.442695, %v283_v2  ;;  %v268_v19 = vmul.f32 %v412_v32, %v880_v3  ;;  %v308_v17 = vmul.f32 1.442695, %v305_v53 }
  0x50   :  { %v426_v42 = vpop.eup %425  ;;  %445 = vpow2.f32 %v180_v49  ;;  %v205_v48 = vadd.f32 %v420_v43, %v183_v10  ;;  %v270_v38 = vadd.f32 %v412_v32, %v248_v18  ;;  %v881_v25 = vsub.f32 %v604_v4, %v634_v23 }
  0x51   :  { %v428_v39 = vpop.eup %427  ;;  %447 = vpow2.f32 %v198_v61  ;;  %v250_v0 = vadd.f32 %v246_v27, %v228_v58  ;;  %v882_v13 = vsub.f32 %v608_v7, %v641_v28  ;;  %v324_v8 = vmul.f32 1.442695, %v321_v33 }
  0x52   :  { %v811_v47 = vpop.eup %429  ;;  %449 = vpow2.f32 %v220_v16  ;;  %v203_v56 = vmul.f32 %v420_v43, %v881_v25  ;;  %v227_v6 = vadd.f32 %v422_v5, %v205_v48  ;;  %v883_v2 = vsub.f32 %v612_v9, %v666_v44 }
  0x53   :  { %v432_v1 = vpop.eup %431  ;;  %451 = vpow2.f32 %v242_v50  ;;  %v225_v49 = vmul.f32 %v422_v5, %v882_v13  ;;  %v346_v23 = vmul.f32 1.442695, %v343_v57  ;;  %v884_v48 = vsub.f32 %v620_v14, %v650_v34 }
  0x54   :  { %v434_v61 = vpop.eup %433  ;;  %453 = vpow2.f32 %v264_v59  ;;  %v207_v26 = vadd.f32 %v203_v56, %v183_v10  ;;  %v247_v32 = vmul.f32 %v424_v24, %v883_v2  ;;  %v249_v4 = vadd.f32 %v424_v24, %v227_v6 }
  0x55   :  { %v436_v16 = vpop.eup %435  ;;  %455 = vpow2.f32 %v286_v60  ;;  %v290_v43 = vmul.f32 %v782_v55, %v884_v48  ;;  %v885_v7 = vsub.f32 %v629_v20, %v660_v41  ;;  %v886_v9 = vsub.f32 %v622_v15, %v701_v63 }
  0x56   :  { %v438_v50 = vpop.eup %437  ;;  %457 = vpow2.f32 %v308_v17  ;;  %v229_v33 = vadd.f32 %v225_v49, %v207_v26  ;;  %v292_v57 = vadd.f32 %v782_v55, %v270_v38  ;;  %v272_v14 = vadd.f32 %v268_v19, %v250_v0 }
  0x57   :  { %v312_v28 = vmul.f32 %v787_v12, %v885_v7  ;;  %v269_v44 = vmul.f32 %v426_v42, %v886_v9  ;;  %v440_v5 = vpop.eup %439  ;;  %459 = vpow2.f32 %v770_v31  ;;  %v186_v34 = vmul.f32 0.0, %v432_v1 }
  0x58   :  { %v442_v27 = vpop.eup %441  ;;  %461 = vpow2.f32 %v778_v62  ;;  %v271_v24 = vadd.f32 %v426_v42, %v249_v4  ;;  %v251_v53 = vadd.f32 %v247_v32, %v229_v33  ;;  %v326_v20 = vsub.f32 %v669_v46, %v743_v11 }
  0x59   :  { %v444_v41 = vpop.eup %443  ;;  %463 = vpow2.f32 %v324_v8  ;;  %v887_v15 = vsub.f32 %v631_v21, %v728_v45  ;;  %v208_v18 = vadd.f32 %v434_v61, %v186_v34  ;;  %v348_v31 = vsub.f32 %v726_v40, %v743_v11 }
  0x5a   :  { %v446_v55 = vpop.eup %445  ;;  %465 = vpow2.f32 %v346_v23  ;;  %v273_v10 = vadd.f32 %v269_v44, %v251_v53  ;;  %v328_v59 = vmul.f32 1.442695, %v326_v20  ;;  %v327_v62 = vsub.f32 %v758_v54, %v776_v37 }
  0x5b   :  { %v291_v63 = vmul.f32 %v428_v39, %v887_v15  ;;  %v448_v42 = vpop.eup %447  ;;  %v294_v58 = vadd.f32 %v290_v43, %v272_v14  ;;  %v230_v60 = vadd.f32 %v436_v16, %v208_v18  ;;  %v350_v3 = vmul.f32 1.442695, %v348_v31 }
  0x5c   :  { %v187_v19 = vmul.f32 0.0, %v446_v55  ;;  %v450_v17 = vpop.eup %449  ;;  %v293_v38 = vadd.f32 %v428_v39, %v271_v24  ;;  %467 = vpow2.f32 %v328_v59  ;;  %v330_v21 = vmul.f32 1.442695, %v327_v62 }
  0x5d   :  { %v349_v45 = vsub.f32 %v767_v22, %v776_v37  ;;  %v452_v11 = vpop.eup %451  ;;  %v314_v25 = vadd.f32 %v787_v12, %v292_v57  ;;  %v252_v56 = vadd.f32 %v438_v50, %v230_v60  ;;  %469 = vpow2.f32 %v350_v3 }
  0x5e   :  { %v209_v1 = vadd.f32 %v448_v42, %v187_v19  ;;  %v454_v6 = vpop.eup %453  ;;  %v295_v0 = vadd.f32 %v291_v63, %v273_v10  ;;  %v888_v13 = vsub.f32 %v645_v30, %v730_v51  ;;  %471 = vpow2.f32 %v330_v21 }
  0x5f   :  { %v352_v39 = vmul.f32 1.442695, %v349_v45  ;;  %v456_v61 = vpop.eup %455  ;;  %v354_v8 = vsub.f32 %v652_v35, %v726_v40  ;;  %v274_v37 = vadd.f32 %v440_v5, %v252_v56  ;;  %v315_v12 = vadd.f32 %v811_v47, %v293_v38 }
  0x60   :  { %v313_v49 = vmul.f32 %v811_v47, %v888_v13  ;;  %v231_v26 = vadd.f32 %v450_v17, %v209_v1  ;;  %v458_v2 = vpop.eup %457  ;;  %v316_v32 = vadd.f32 %v312_v28, %v294_v58  ;;  %v333_v16 = vsub.f32 %v654_v36, %v758_v54 }
  0x61   :  { %473 = vpow2.f32 %v352_v39  ;;  %v460_v4 = vpop.eup %459  ;;  %v355_v30 = vsub.f32 %v681_v52, %v767_v22  ;;  %v296_v51 = vadd.f32 %v442_v27, %v274_v37  ;;  %v889_v35 = vsub.f32 %v643_v29, %v669_v46 }
  0x62   :  { %v253_v23 = vadd.f32 %v452_v11, %v231_v26  ;;  %v462_v48 = vpop.eup %461  ;;  %v336_v43 = vadd.f32 %v460_v4, %v314_v25  ;;  %v317_v50 = vadd.f32 %v313_v49, %v295_v0 }
  0x63   :  { %v334_v40 = vmul.f32 %v460_v4, %v889_v35  ;;  %v464_v7 = vpop.eup %463  ;;  %v356_v47 = vmul.f32 %v462_v48, %v354_v8  ;;  %v318_v28 = vadd.f32 %v444_v41, %v296_v51 }
  0x64   :  { %v275_v33 = vadd.f32 %v454_v6, %v253_v23  ;;  %v466_v9 = vpop.eup %465  ;;  %v358_v36 = vadd.f32 %v462_v48, %v336_v43  ;;  %v337_v54 = vadd.f32 %v464_v7, %v315_v12  ;;  %v335_v5 = vmul.f32 %v464_v7, %v333_v16 }
  0x65   :  { %v338_v44 = vadd.f32 %v334_v40, %v316_v32  ;;  %v357_v57 = vmul.f32 %v466_v9, %v355_v30 }
  0x66   :  { %v297_v52 = vadd.f32 %v456_v61, %v275_v33  ;;  %v468_v22 = vpop.eup %467  ;;  %366 = vst [vmem:[#allocation7 + $0x10] sm:$0xff] %v358_v36  ;;  %v359_v14 = vadd.f32 %v466_v9, %v337_v54  ;;  %v339_v27 = vadd.f32 %v335_v5, %v317_v50 }
  0x67   :  { %v360_v34 = vadd.f32 %v356_v47, %v338_v44  ;;  %v470_v24 = vpop.eup %469  ;;  %v340_v29 = vadd.f32 %v468_v22, %v318_v28 }
  0x68   :  { %v319_v46 = vadd.f32 %v458_v2, %v297_v52  ;;  %v472_v53 = vpop.eup %471  ;;  %367 = vst [vmem:[#allocation7 + $0x18] sm:$0xff] %v359_v14  ;;  %v361_v20 = vadd.f32 %v357_v57, %v339_v27 }
  0x69   :  { %368 = vst [vmem:[#allocation7 + $0x20] sm:$0xff] %v360_v34  ;;  %v362_v41 = vadd.f32 %v470_v24, %v340_v29 }
  0x6a   :  { %v341_v15 = vadd.f32 %v472_v53, %v319_v46  ;;  %369 = vst [vmem:[#allocation7 + $0x28] sm:$0xff] %v361_v20 }
  0x6b   :  { %v474_v63 = vpop.eup %473  ;;  %372 = vst [vmem:[#allocation7 + $0x40] sm:$0xff] %v362_v41 }
  0x6c   :  { %v363_v18 = vadd.f32 %v474_v63, %v341_v15 }
  0x6e   :  { %373 = vst [vmem:[#allocation7 + $0x48] sm:$0xff] %v363_v18 }
  0x6f   :  { %530 = shalt.err (!%p527_p6)
}
  0x70   :  { %s531_s10 = scalar_lea.hbm %s879_s2, 1280 }
  0x71   :  { %p532_p7 = scmp.ne.s32.totalorder %s879_s2, %s531_s10  ;;  %p535_p8 = scmp.lt.u32.totalorder %s531_s10, %s879_s2 }
  0x73   :  { %p537_p9 = pnand %p535_p8, %p532_p7 }
  0x75   :  { %540 = shalt.err (!%p537_p9)
}
  0x76   :  { %385 = dma.vmem_to_hbm [thread:$0]  %s380_s6, 1280, %s879_s2, [#allocation4], %s548_s19, %s548_s19, %s549_s20  }
  0x77   :  { %545 = dma.done.wait [#allocation4], 1280  }
  0x78   :  { %546 = vsyncadd [#allocation4], 4294966016 }
  0x79   :  { %389 = vsyncpa [#allocation3], 1 }
  0x7a   :  { %390 = vsyncpa [#allocation6], 1 }
  0x7b   :  { %391 = vsyncpa [#allocation4], 1 }

</bundles_post_ra>
